<compile_context>
chip_gen: v7x
topology: tpu7x:2x2x1
jax: 0.10.0
libtpu: 0.0.40
codegen_flags: <defaults>
</compile_context>

<pallas_src>
import functools

import jax
import jax.numpy as jnp
from jax.experimental import pallas as pl
from jax.experimental.pallas import tpu as pltpu


def _round_up(x, m):
    return ((x + m - 1) // m) * m


def _vmem_capacity_bytes():
    # Generation-aware budget (v7x: 64 MiB/TC, v5e/v6e: 128 MiB).  Fall back to
    # the most conservative (v7x) figure if the query is unavailable.
    try:
        cap = int(pltpu.get_tpu_info().vmem_capacity_bytes)
        if cap >= 32 * 1024 * 1024:
            return cap
    except Exception:
        pass
    return 64 * 1024 * 1024


# ----------------------------------------------------------------------------
# Kernels
# ----------------------------------------------------------------------------
def _knet_matmul_kernel(x_ref, wt_ref, o_ref):
    # x_ref : (tm, n_input)  activations in native dtype (cast here, on VPU)
    # wt_ref: (n_input, tn)  prepared W.T tile (compute dtype), tn % 128 == 0
    # o_ref : (tm, tn)       lane-dense output tile
    x = x_ref[...].astype(wt_ref.dtype)
    o_ref[...] = jnp.dot(
        x, wt_ref[...], preferred_element_type=jnp.float32
    ).astype(o_ref.dtype)


def _knet_matmul_acc_kernel(x_ref, wt_ref, o_ref, acc_ref):
    # Large-n_input path: grid = (num_m, num_n, num_k), K innermost
    # ("arbitrary"), f32 accumulator kept in VMEM scratch across K steps.
    k = pl.program_id(2)

    @pl.when(k == 0)
    def _():
        acc_ref[...] = jnp.zeros_like(acc_ref)

    x = x_ref[...].astype(wt_ref.dtype)
    acc_ref[...] += jnp.dot(x, wt_ref[...], preferred_element_type=jnp.float32)

    @pl.when(k == pl.num_programs(2) - 1)
    def _():
        o_ref[...] = acc_ref[...].astype(o_ref.dtype)


def _knet_rollout_kernel(x_ref, wt_ref, o_ref, *, n_steps):
    # Recurrent rollout fused into one kernel: y_{t+1} = y_t @ W.T with the
    # (square-padded) weight resident in VMEM for the whole loop.
    w = wt_ref[...]
    y0 = x_ref[...].astype(w.dtype)

    def body(_, y):
        return jnp.dot(y, w, preferred_element_type=jnp.float32).astype(w.dtype)

    y = jax.lax.fori_loop(0, n_steps, body, y0)
    o_ref[...] = y.astype(o_ref.dtype)


# ----------------------------------------------------------------------------
# One-time weight preparation (hoisted out of the per-call hot path).
# ----------------------------------------------------------------------------
def prepare_knet_weight(weight, compute_dtype=jnp.bfloat16):
    """Transpose + zero-pad the output dim to a multiple of 128 (lane-dense)."""
    n_output, n_input = weight.shape
    n_pad = _round_up(n_output, 128)
    wt = weight.T  # (n_input, n_output)
    if n_pad != n_output:
        wt = jnp.pad(wt, ((0, 0), (0, n_pad - n_output)))
    return wt.astype(compute_dtype)


def prepare_knet_rollout_weight(weight, compute_dtype=jnp.float32):
    """Square-padded W.T (n_pad, n_pad) for the fused recurrent rollout."""
    n_output, n_input = weight.shape
    assert n_output == n_input, "recurrent rollout needs a square operator"
    n_pad = _round_up(n_output, 128)
    wt = weight.T
    wt = jnp.pad(wt, ((0, n_pad - n_input), (0, n_pad - n_output)))
    return wt.astype(compute_dtype)


# ----------------------------------------------------------------------------
# K_Net forward: data @ W.T using the prepared (transposed/padded) weight.
# ----------------------------------------------------------------------------
def knet_forward(data, wt_prepared, n_output, *, max_tile_m=512, max_tile_n=512):
    """data: (..., n_input); wt_prepared: (n_input, n_pad); returns (..., n_output)."""
    n_input, n_pad = wt_prepared.shape
    out_dtype = data.dtype
    lead_shape = data.shape[:-1]

    # NOTE: no .astype here — the cast to compute dtype happens inside the
    # kernel (VPU, hidden under DMA/MXU), avoiding an extra HBM pass over x.
    x = data.reshape((-1, n_input))
    m = x.shape[0]

    xb = jnp.dtype(x.dtype).itemsize
    wb = jnp.dtype(wt_prepared.dtype).itemsize
    ob = jnp.dtype(out_dtype).itemsize
    sublane = 8 * max(1, 4 // xb)  # sublane quantum for x-tile rows

    vmem_cap = _vmem_capacity_bytes()
    budget = int(vmem_cap * 0.7)

    weight_bytes = n_input * n_pad * wb
    resident = weight_bytes <= min(16 * 1024 * 1024, budget // 4)

    max_tile_m = max(sublane, _round_up(max_tile_m, sublane))
    tm = m if m <= max_tile_m else max_tile_m

    if resident:
        # ---- Fast path: whole W.T resident in VMEM, single N block. --------
        tn = n_pad

        def footprint(tm_):
            return (2 * tm_ * n_input * xb      # double-buffered x tiles
                    + 2 * weight_bytes          # weight (budgeted 2x, resident)
                    + 2 * tm_ * n_pad * ob)     # double-buffered out tiles

        while footprint(tm) > budget and tm > sublane:
            tm = max(sublane, _round_up(tm // 2, sublane))

        num_m = pl.cdiv(m, tm)
        grid = (num_m,)
        in_specs = [
            pl.BlockSpec((tm, n_input), lambda i: (i, 0)),
            pl.BlockSpec((n_input, n_pad), lambda i: (0, 0)),  # constant -> resident
        ]
        out_specs = pl.BlockSpec((tm, n_pad), lambda i: (i, 0))
        scratch_shapes = []
        dims = ("parallel",)
        kernel = _knet_matmul_kernel
        bytes_accessed = m * n_input * xb + weight_bytes + m * n_pad * ob
    else:
        # ---- Large-weight path: tile N and K, f32 accumulator in VMEM. -----
        tn = min(n_pad, max(128, _round_up(max_tile_n, 128)))
        while n_pad % tn != 0:
            tn -= 128

        tk = n_input
        for cand in (2048, 1024, 512, 256, 128):
            if n_input % cand == 0:
                tk = cand
                break
        # TODO(synk): if n_input is not a multiple of 128 the K axis stays
        # untiled; add in-kernel K masking if such shapes ever matter.

        def footprint(tm_):
            return (2 * tm_ * tk * xb + 2 * tk * tn * wb
                    + 2 * tm_ * tn * ob + tm_ * tn * 4)

        while footprint(tm) > budget and tm > sublane:
            tm = max(sublane, _round_up(tm // 2, sublane))

        num_m = pl.cdiv(m, tm)
        num_n = n_pad // tn
        num_k = pl.cdiv(n_input, tk)
        grid = (num_m, num_n, num_k)
        in_specs = [
            pl.BlockSpec((tm, tk), lambda i, j, k: (i, k)),
            pl.BlockSpec((tk, tn), lambda i, j, k: (k, j)),
        ]
        out_specs = pl.BlockSpec((tm, tn), lambda i, j, k: (i, j))
        scratch_shapes = [pltpu.VMEM((tm, tn), jnp.float32)]
        dims = ("parallel", "parallel", "arbitrary")
        kernel = _knet_matmul_acc_kernel
        bytes_accessed = (m * n_input * xb * num_n
                          + weight_bytes * num_m + m * n_pad * ob)

    cost = pl.CostEstimate(flops=2 * m * n_input * n_pad,
                           bytes_accessed=int(bytes_accessed),
                           transcendentals=0)
    vmem_limit = int(min(vmem_cap, max(32 * 1024 * 1024, 2 * footprint(tm))))

    out = pl.pallas_call(
        kernel,
        out_shape=jax.ShapeDtypeStruct((m, n_pad), out_dtype),
        grid_spec=pltpu.PrefetchScalarGridSpec(
            num_scalar_prefetch=0,
            grid=grid,
            in_specs=in_specs,
            out_specs=out_specs,
            scratch_shapes=scratch_shapes,
        ),
        compiler_params=pltpu.CompilerParams(
            dimension_semantics=dims,
            vmem_limit_bytes=vmem_limit,
        ),
        cost_estimate=cost,
    )(x, wt_prepared)

    if n_pad != n_output:
        # TODO(synk): let downstream consumers take the padded slab to skip this pass.
        out = out[:, :n_output]
    return out.reshape(lead_shape + (n_output,))


# ----------------------------------------------------------------------------
# Fused recurrent rollout: n_steps applications of K in a single pallas_call.
# ----------------------------------------------------------------------------
def knet_rollout(data, wt_square, n_output, n_steps, *, max_tile_m=256):
    """data: (..., n_input) with n_input == n_output; wt_square: (n_pad, n_pad)."""
    n_pad = wt_square.shape[0]
    n_input = data.shape[-1]
    lead_shape = data.shape[:-1]
    out_dtype = data.dtype

    x = data.reshape((-1, n_input))
    if n_pad != n_input:
        # One-time pad (amortized over all timesteps); padded columns hit the
        # zero rows of the square-padded weight, so they never contaminate y.
        x = jnp.pad(x, ((0, 0), (0, n_pad - n_input)))
    m = x.shape[0]

    xb = jnp.dtype(x.dtype).itemsize
    wb = jnp.dtype(wt_square.dtype).itemsize
    ob = jnp.dtype(out_dtype).itemsize
    sublane = 8 * max(1, 4 // xb)

    vmem_cap = _vmem_capacity_bytes()
    budget = int(vmem_cap * 0.6)

    max_tile_m = max(sublane, _round_up(max_tile_m, sublane))
    tm = m if m <= max_tile_m else max_tile_m

    def footprint(tm_):
        return (2 * tm_ * n_pad * xb + 2 * n_pad * n_pad * wb
                + 2 * tm_ * n_pad * ob + 2 * tm_ * n_pad * 4)  # + live carry

    while footprint(tm) > budget and tm > sublane:
        tm = max(sublane, _round_up(tm // 2, sublane))

    num_m = pl.cdiv(m, tm)
    kernel = functools.partial(_knet_rollout_kernel, n_steps=n_steps)

    cost = pl.CostEstimate(
        flops=2 * m * n_pad * n_pad * max(int(n_steps), 1),
        bytes_accessed=m * n_pad * (xb + ob) + n_pad * n_pad * wb,
        transcendentals=0,
    )
    vmem_limit = int(min(vmem_cap, max(32 * 1024 * 1024, 2 * footprint(tm))))

    out = pl.pallas_call(
        kernel,
        out_shape=jax.ShapeDtypeStruct((m, n_pad), out_dtype),
        grid_spec=pltpu.PrefetchScalarGridSpec(
            num_scalar_prefetch=0,
            grid=(num_m,),
            in_specs=[
                pl.BlockSpec((tm, n_pad), lambda i: (i, 0)),
                pl.BlockSpec((n_pad, n_pad), lambda i: (0, 0)),  # resident weight
            ],
            out_specs=pl.BlockSpec((tm, n_pad), lambda i: (i, 0)),
        ),
        compiler_params=pltpu.CompilerParams(
            dimension_semantics=("parallel",),
            vmem_limit_bytes=vmem_limit,
        ),
        cost_estimate=cost,
    )(x, wt_square)

    if n_pad != n_output:
        out = out[:, :n_output]
    return out.reshape(lead_shape + (n_output,))


# ----------------------------------------------------------------------------
# Deterministic parameter init: Haar-uniform orthogonal weight, matching
# geotorch's M.sample('uniform') in reset_parameters().
# ----------------------------------------------------------------------------
def init_orthogonal_weight(key, n_output, n_input, dtype=jnp.float32):
    a = jax.random.normal(key, (n_output, n_input), dtype=jnp.float32)
    q, r = jnp.linalg.qr(a)
    d = jnp.sign(jnp.diagonal(r))
    d = jnp.where(d == 0, 1.0, d)
    q = q * d[None, :]
    return q.astype(dtype)


if __name__ == "__main__":
    n_input = 32
    n_output = 32
    batch = 64
    n_steps = 8

    key = jax.random.PRNGKey(0)
    k_w, k_x = jax.random.split(key)

    weight = init_orthogonal_weight(k_w, n_output, n_input)  # (32, 32) orthogonal
    data = jax.random.normal(k_x, (batch, n_input), dtype=jnp.float32)

    y_ref = data @ weight.T

    # f32 compute path: tight check against the plain-JAX reference.
    wt_f32 = prepare_knet_weight(weight, compute_dtype=jnp.float32)
    y_f32 = jax.block_until_ready(knet_forward(data, wt_f32, n_output))
    assert y_f32.shape == (batch, n_output)
    assert jnp.allclose(y_f32, y_ref, atol=1e-4, rtol=1e-4)

    # bf16 compute path (kernel casts x on the fly; f32 MXU accumulation).
    wt_bf16 = prepare_knet_weight(weight, compute_dtype=jnp.bfloat16)
    y_bf16 = jax.block_until_ready(knet_forward(data, wt_bf16, n_output))
    assert y_bf16.shape == (batch, n_output)
    assert jnp.allclose(y_bf16, y_ref, atol=5e-2, rtol=5e-2)

    # Fused recurrent rollout: n_steps applications of K in one pallas_call
    # (weight resident in VMEM the whole time).  f32 for long-horizon accuracy.
    wt_sq = prepare_knet_rollout_weight(weight, compute_dtype=jnp.float32)
    y_roll = jax.block_until_ready(knet_rollout(data, wt_sq, n_output, n_steps))
    roll_ref = data
    for _ in range(n_steps):
        roll_ref = roll_ref @ weight.T
    assert y_roll.shape == (batch, n_output)
    assert jnp.allclose(y_roll, roll_ref, atol=1e-3, rtol=1e-3)

    print("KERNEL_OK")
</pallas_src>

<mosaic_0001>
module attributes {stable_mosaic.version = 11 : i64} {
  func.func @_knet_matmul_kernel(%arg0: i32, %arg1: memref<64x32xf32, #tpu.memory_space<vmem>>, %arg2: memref<32x128xf32, #tpu.memory_space<vmem>>, %arg3: memref<64x128xf32, #tpu.memory_space<vmem>>) attributes {dimension_semantics = [#tpu.dimension_semantics<parallel>], iteration_bounds = array<i64: 1>, scalar_prefetch = 0 : i64, scratch_operands = 0 : i64, tpu.core_type = #tpu.core_type<tc>, window_params = [{transform_indices = @transform_0, window_bounds = array<i64: 64, 32>}, {pipeline_mode = #tpu.pipeline_mode<synchronous>, transform_indices = @transform_1, window_bounds = array<i64: 32, 128>}, {transform_indices = @transform_2, window_bounds = array<i64: 64, 128>}]} {
    %c0 = arith.constant 0 : index
    %c0_0 = arith.constant 0 : index
    %0 = vector.load %arg1[%c0, %c0_0] : memref<64x32xf32, #tpu.memory_space<vmem>>, vector<64x32xf32>
    %c0_1 = arith.constant 0 : index
    %c0_2 = arith.constant 0 : index
    %1 = vector.load %arg2[%c0_1, %c0_2] : memref<32x128xf32, #tpu.memory_space<vmem>>, vector<32x128xf32>
    %cst = arith.constant dense<0.000000e+00> : vector<64x128xf32>
    %2 = tpu.matmul %0, %1, %cst {dimension_numbers = #tpu.dot_dimension_numbers<[1], [0], [0], [1], [0, 0, 1, 1], [], []>} : vector<64x32xf32>, vector<32x128xf32>, vector<64x128xf32> -> vector<64x128xf32>
    %c0_3 = arith.constant 0 : index
    %c0_4 = arith.constant 0 : index
    %3 = vector.load %arg3[%c0_3, %c0_4] : memref<64x128xf32, #tpu.memory_space<vmem>>, vector<64x128xf32>
    tpu.vector_store %arg3[%c0_3, %c0_4], %2 {strides = array<i32>} : memref<64x128xf32, #tpu.memory_space<vmem>>, vector<64x128xf32>,
    return
  }
  func.func @transform_0(%arg0: i32) -> (i32, i32) {
    %c0_i32 = arith.constant 0 : i32
    %c0_i32_0 = arith.constant 0 : i32
    return %arg0, %c0_i32 : i32, i32
  }
  func.func @transform_1(%arg0: i32) -> (i32, i32) {
    %c0_i32 = arith.constant 0 : i32
    %c0_i32_0 = arith.constant 0 : i32
    %c0_i32_1 = arith.constant 0 : i32
    return %c0_i32, %c0_i32_0 : i32, i32
  }
  func.func @transform_2(%arg0: i32) -> (i32, i32) {
    %c0_i32 = arith.constant 0 : i32
    %c0_i32_0 = arith.constant 0 : i32
    return %arg0, %c0_i32 : i32, i32
  }
}

</mosaic_0001>

<bundles_post_ra>
// kernel: tpu_custom_call.1
= control target key start
LH: loop header
LB: loop body
LE: loop exit
PB: predicated region body
PF: predicated region fallthrough
CT: control target
= control target key end

     0   :  { %vm24_vm0 = vcmask 261120   ;;  %s331_s0 = inlined_call_operand.vmem [shape: f32[64,32], index: 0, kind: input, shape index: {}]   ;;  %s332_s1 = inlined_call_operand.vmem [shape: f32[32,128], index: 1, kind: input, shape index: {}]   ;;  %s333_s2 = inlined_call_operand.hbm [shape: f32[64,128], index: 2, kind: output, shape index: {}]  }
   0x1   :  { %v20_v0 = vld [vmem:[%s332_s1] sm:$0xff]  ;;  %v21_v1 = vld [vmem:[%s332_s1 + $0x8] sm:$0xff]  ;;  %v22_v2 = vld [vmem:[%s332_s1 + $0x10] sm:$0xff] }
   0x2   :  { %v218_v3 = vpack.c.bf16 %v21_v1, %v20_v0  ;;  %v23_v4 = vld [vmem:[%s332_s1 + $0x18] sm:$0xff]  ;;  %v12_v5 = vld [vmem:[%s331_s0] sm:$0xff] }
   0x3   :  { %v16_v6 = vld [vmem:[%s331_s0 + $0x20] sm:$0xff]  ;;  %v222_v7 = vpack.c.bf16 %v23_v4, %v22_v2  ;;  %206 = vmatprep.mubr.msk.f32.mxu0 %vm24_vm0, %v12_v5 }
   0x4   :  { %212 = vmatprep.mubr.msk.f32.mxu1 %vm24_vm0, %v16_v6  ;;  %219 = vmatprep.subr.bf16.mxu0 %v218_v3 }
   0x5   :  { %226 = vmatprep.subr.bf16.mxu1 %v218_v3  ;;  %221 = vmatpush3.bf16.msra.mxu0 %v218_v3 }
   0x6   :  { %228 = vmatpush3.bf16.msra.mxu1 %v218_v3 }
   0x7   :  { %7 = vsyncpa [#allocation3], 0  ;;  %223 = vmatprep.subr.bf16.mxu0 %v222_v7  ;;  %227 = vmatprep.subr.bf16.mxu1 %v222_v7  ;;  %v13_v8 = vld [vmem:[%s331_s0 + $0x8] sm:$0xff]  ;;  %v14_v10 = vld [vmem:[%s331_s0 + $0x10] sm:$0xff]  ;;  %s257_s4 = smov [#allocation2]  }
   0x8   :  { %v17_v9 = vld [vmem:[%s331_s0 + $0x28] sm:$0xff]  ;;  %v18_v11 = vld [vmem:[%s331_s0 + $0x30] sm:$0xff]  ;;  %v15_v12 = vld [vmem:[%s331_s0 + $0x18] sm:$0xff]  ;;  %s167_s5 = sshll.u32 %s257_s4, 4  ;;  %s168_s5 = int_to_ptr.vmem [resolvable:$true] %s167_s5 }
   0x9   :  { %225 = vmatpush3.bf16.msra.mxu0 %v222_v7  ;;  %v19_v13 = vld [vmem:[%s331_s0 + $0x38] sm:$0xff]  ;;  %s233_s0 = scalar_lea.vmem %s168_s5, 1024  ;;  %p238_p1 = scmp.lt.s32.totalorder %s168_s5, %s168_s5 }
   0xa   :  { %229 = vmatpush3.bf16.msra.mxu1 %v222_v7  ;;  %p234_p0 = scmp.ne.s32.totalorder %s168_s5, %s233_s0  ;;  %p239_p2 = scmp.lt.s32.totalorder %s233_s0, %s233_s0 }
   0xc   :  { %207 = vmatmul.mubr.msk.f32.vlgmr.msra.gmra.mrb[0].mxu0 %vm24_vm0, %v13_v8  ;;  %p240_p3 = por %p239_p2, %p238_p1 }
   0xd   :  { %213 = vmatmul.mubr.msk.f32.vlgmr.msra.gmra.mrb[0].mxu1 %vm24_vm0, %v17_v9  ;;  %209 = vmatprep.mubr.msk.f32.mxu0 %vm24_vm0, %v14_v10 }
   0xe   :  { %215 = vmatprep.mubr.msk.f32.mxu1 %vm24_vm0, %v18_v11  ;;  %p241_p4 = pnand %p240_p3, %p234_p0 }
  0x10   :  { %210 = vmatmul.mubr.msk.f32.gmra.mrb[2].mxu0 %vm24_vm0, %v15_v12 }
  0x11   :  { %216 = vmatmul.mubr.msk.f32.gmra.mrb[2].mxu1 %vm24_vm0, %v19_v13 }
  0xdf   :  { %v208_v14 = vpop.f32.mrb[0].mxu0 }
  0xe0   :  { %v214_v15 = vpop.f32.mrb[0].mxu1  ;;  %155 = vst [vmem:[#allocation2 + $0x8] sm:$0xff] %v208_v14  ;;  %v115_v16 = vpop.f32.mrb[1].mxu0 }
  0xe1   :  { %159 = vst [vmem:[#allocation2 + $0x28] sm:$0xff] %v214_v15  ;;  %v135_v17 = vpop.f32.mrb[1].mxu1  ;;  %154 = vst [vmem:[#allocation2] sm:$0xff] %v115_v16 }
  0xe2   :  { %158 = vst [vmem:[#allocation2 + $0x20] sm:$0xff] %v135_v17 }
  0xe3   :  { %v211_v18 = vpop.f32.mrb[2].mxu0 }
  0xe4   :  { %v217_v19 = vpop.f32.mrb[2].mxu1  ;;  %157 = vst [vmem:[#allocation2 + $0x18] sm:$0xff] %v211_v18  ;;  %v125_v20 = vpop.f32.mrb[3].mxu0 }
  0xe5   :  { %161 = vst [vmem:[#allocation2 + $0x38] sm:$0xff] %v217_v19  ;;  %v145_v21 = vpop.f32.mrb[3].mxu1  ;;  %156 = vst [vmem:[#allocation2 + $0x10] sm:$0xff] %v125_v20 }
  0xe6   :  { %160 = vst [vmem:[#allocation2 + $0x30] sm:$0xff] %v145_v21 }
  0xe7   :  { %244 = shalt.err (!%p241_p4)
}
  0xe8   :  { %s245_s8 = scalar_lea.hbm %s333_s2, 1024 }
  0xe9   :  { %p246_p5 = scmp.ne.s32.totalorder %s333_s2, %s245_s8  ;;  %p249_p6 = scmp.lt.u32.totalorder %s245_s8, %s333_s2 }
  0xeb   :  { %p251_p7 = pnand %p249_p6, %p246_p5 }
  0xed   :  { %254 = shalt.err (!%p251_p7)
}
  0xee   :  { %s258_s13 = smov 128   ;;  %s259_s14 = smov 8  }
  0xef   :  { %173 = dma.vmem_to_hbm [thread:$0]  %s168_s5, 1024, %s333_s2, [#allocation3], %s258_s13, %s258_s13, %s259_s14  }
  0xf0   :  { %255 = dma.done.wait [#allocation3], 1024  }
  0xf1   :  { %256 = vsyncadd [#allocation3], 4294966272 }
  0xf2   :  { %177 = vsyncpa [#allocation3], 1 }

</bundles_post_ra>
